<compile_context>
chip_gen: v6e
topology: v6e:2x2x1
jax: 0.10.0
libtpu: 0.0.40
codegen_flags: <defaults>
</compile_context>

<pallas_src>
import functools
import math

import jax
import jax.numpy as jnp
from jax.experimental import pallas as pl
from jax.experimental.pallas import tpu as pltpu


_RHS_RESIDENT_BYTES = 8 * 1024 * 1024  # keep full-K RHS panel in VMEM if <= 8 MiB


# ---------------------------------------------------------------------------
# helpers
# ---------------------------------------------------------------------------
def _round_up(x: int, m: int) -> int:
    return ((x + m - 1) // m) * m


def _divisor_tile(dim: int, pref: int, unit: int) -> int:
    """Largest multiple of `unit` <= pref that divides `dim` (dim is a multiple of unit)."""
    if dim <= pref:
        return dim
    t = (pref // unit) * unit
    while t >= unit:
        if dim % t == 0:
            return t
        t -= unit
    return dim


def _pad2d(a, rows, cols, dtype):
    a = a.astype(dtype)
    pr, pc = rows - a.shape[0], cols - a.shape[1]
    if pr or pc:
        a = jnp.pad(a, ((0, pr), (0, pc)))
    return a


def _pad1d(a, n):
    a = a.astype(jnp.float32)
    if a.shape[0] != n:
        a = jnp.pad(a, (0, n - a.shape[0]))
    return a


# ---------------------------------------------------------------------------
# Kernel A: xw = x @ W + b   (bias added in the k==last epilogue only)
# ---------------------------------------------------------------------------
def _linear_bias_kernel(x_ref, w_ref, b_ref, o_ref, acc_ref, *, tk, rhs_resident):
    k = pl.program_id(2)
    n_k = pl.num_programs(2)

    if rhs_resident:
        w_blk = w_ref[pl.ds(k * tk, tk), :]        # full-K resident panel, slice per step
    else:
        w_blk = w_ref[...]
    prod = jnp.dot(x_ref[...], w_blk, preferred_element_type=jnp.float32)

    @pl.when(k == 0)
    def _():
        acc_ref[...] = prod                         # no zero-init pass

    @pl.when(k > 0)
    def _():
        acc_ref[...] += prod

    @pl.when(k == n_k - 1)
    def _():
        o_ref[...] = (acc_ref[...] + b_ref[...]).astype(o_ref.dtype)


def linear_bias(x, w, b, *, tm, tn, tk, rhs_resident=False, out_dtype=jnp.bfloat16):
    M, K = x.shape
    Kw, N = w.shape
    assert K == Kw and M % tm == 0 and N % tn == 0 and K % tk == 0
    b2d = b.reshape(1, N).astype(jnp.float32)
    grid = (M // tm, N // tn, K // tk)

    if rhs_resident:
        w_spec = pl.BlockSpec((K, tn), lambda i, j, k: (0, j))
    else:
        w_spec = pl.BlockSpec((tk, tn), lambda i, j, k: (k, j))

    kernel = functools.partial(_linear_bias_kernel, tk=tk, rhs_resident=rhs_resident)
    return pl.pallas_call(
        kernel,
        out_shape=jax.ShapeDtypeStruct((M, N), out_dtype),
        grid_spec=pltpu.PrefetchScalarGridSpec(
            num_scalar_prefetch=0,
            grid=grid,
            in_specs=[
                pl.BlockSpec((tm, tk), lambda i, j, k: (i, k)),   # x
                w_spec,                                           # W
                pl.BlockSpec((1, tn), lambda i, j, k: (0, j)),    # bias
            ],
            out_specs=pl.BlockSpec((tm, tn), lambda i, j, k: (i, j)),
            scratch_shapes=[pltpu.VMEM((tm, tn), jnp.float32)],
        ),
        compiler_params=pltpu.CompilerParams(
            dimension_semantics=("parallel", "parallel", "arbitrary")),
        cost_estimate=pl.CostEstimate(
            flops=2 * M * K * N, transcendentals=0,
            bytes_accessed=2 * (M * K + K * N + M * N)),
    )(x, w, b2d)


# ---------------------------------------------------------------------------
# Kernel B: relu(G @ xw) with optional fused dropout and fused (.. @ W2 + b2)
# ---------------------------------------------------------------------------
def _propagate_body(g_ref, xw_ref, w2_ref, b2_ref, o_ref, acc_ref, *,
                    tk, rhs_resident, dropout_p, seed, n_cols, use_hw_prng):
    # program ids at top level only (nested program_id breaks interpret lowering)
    i = pl.program_id(0)
    j = pl.program_id(1)
    k = pl.program_id(2)
    n_k = pl.num_programs(2)

    if rhs_resident:
        xw_blk = xw_ref[pl.ds(k * tk, tk), :]
    else:
        xw_blk = xw_ref[...]
    prod = jnp.dot(g_ref[...], xw_blk, preferred_element_type=jnp.float32)

    @pl.when(k == 0)
    def _():
        acc_ref[...] = prod

    @pl.when(k > 0)
    def _():
        acc_ref[...] += prod

    @pl.when(k == n_k - 1)
    def _():
        h = jnp.maximum(acc_ref[...], 0.0)
        if dropout_p > 0.0:
            tm_, tn_ = acc_ref.shape
            thr = jnp.uint32(min(int(round(dropout_p * 4294967296.0)), 0xFFFFFFFF))
            if use_hw_prng:
                pltpu.prng_seed(seed, i, j)
                bits = pltpu.bitcast(pltpu.prng_random_bits((tm_, tn_)), jnp.uint32)
            else:
                # portable counter-hash fallback (interpret / CPU only)
                rows = (jax.lax.broadcasted_iota(jnp.int32, (tm_, tn_), 0)
                        + i * tm_).astype(jnp.uint32)
                cols = (jax.lax.broadcasted_iota(jnp.int32, (tm_, tn_), 1)
                        + j * tn_).astype(jnp.uint32)
                bits = rows * jnp.uint32(n_cols) + cols
                bits = bits ^ jnp.uint32(seed)
                bits = bits ^ (bits >> 16)
                bits = bits * jnp.uint32(0x7FEB352D)
                bits = bits ^ (bits >> 15)
                bits = bits * jnp.uint32(0x846CA68B)
                bits = bits ^ (bits >> 16)
            keep = bits >= thr                      # keep with prob (1 - p)
            h = jnp.where(keep, h * (1.0 / (1.0 - dropout_p)), 0.0)
        if w2_ref is not None:
            # fused layer-2 linear: (dropout(relu(G@xw1))) @ W2 + b2
            h = jnp.dot(h.astype(w2_ref.dtype), w2_ref[...],
                        preferred_element_type=jnp.float32) + b2_ref[...]
        o_ref[...] = h.astype(o_ref.dtype)


def g_propagate(g, xw, *, w2=None, b2=None, tm, tn, tk, rhs_resident=False,
                dropout_p=0.0, dropout_seed=0, use_hw_prng=False,
                out_dtype=jnp.bfloat16):
    M, K = g.shape
    K2, N = xw.shape
    assert K == K2 and M % tm == 0 and N % tn == 0 and K % tk == 0
    if dropout_p > 0.0:
        assert 0.0 < dropout_p < 1.0
    fuse = w2 is not None
    if fuse:
        assert tn == N and w2.shape == (N, N)
    grid = (M // tm, N // tn, K // tk)

    if rhs_resident:
        xw_spec = pl.BlockSpec((K, tn), lambda i, j, k: (0, j))
    else:
        xw_spec = pl.BlockSpec((tk, tn), lambda i, j, k: (k, j))

    body = functools.partial(
        _propagate_body, tk=tk, rhs_resident=rhs_resident,
        dropout_p=float(dropout_p), seed=int(dropout_seed) & 0x7FFFFFFF,
        n_cols=N, use_hw_prng=bool(use_hw_prng))

    in_specs = [pl.BlockSpec((tm, tk), lambda i, j, k: (i, k)), xw_spec]
    args = [g, xw]
    if fuse:
        in_specs += [pl.BlockSpec((N, N), lambda i, j, k: (0, 0)),   # W2 resident
                     pl.BlockSpec((1, N), lambda i, j, k: (0, 0))]   # b2 resident
        args += [w2, b2.reshape(1, N).astype(jnp.float32)]

        def kernel(g_r, xw_r, w2_r, b2_r, o_r, acc_r):
            body(g_r, xw_r, w2_r, b2_r, o_r, acc_r)
        flops = 2 * M * K * N + 2 * M * N * N
    else:
        def kernel(g_r, xw_r, o_r, acc_r):
            body(g_r, xw_r, None, None, o_r, acc_r)
        flops = 2 * M * K * N

    return pl.pallas_call(
        kernel,
        out_shape=jax.ShapeDtypeStruct((M, N), out_dtype),
        grid_spec=pltpu.PrefetchScalarGridSpec(
            num_scalar_prefetch=0,
            grid=grid,
            in_specs=in_specs,
            out_specs=pl.BlockSpec((tm, tn), lambda i, j, k: (i, j)),
            scratch_shapes=[pltpu.VMEM((tm, tn), jnp.float32)],
        ),
        compiler_params=pltpu.CompilerParams(
            dimension_semantics=("parallel", "parallel", "arbitrary")),
        cost_estimate=pl.CostEstimate(
            flops=flops, transcendentals=0,
            bytes_accessed=2 * (M * K + K * N + 2 * M * N)),
    )(*args)


# ---------------------------------------------------------------------------
# HGNN_embedding: parameter init (matches PyTorch reset_parameters) + forward
# ---------------------------------------------------------------------------
def init_hgnn_embedding_params(key, in_ch, n_hid):
    k1, k2, k3, k4 = jax.random.split(key, 4)
    stdv = 1.0 / math.sqrt(n_hid)  # stdv = 1/sqrt(weight.size(1)) = 1/sqrt(out_ft)
    return {
        "w1": jax.random.uniform(k1, (in_ch, n_hid), jnp.float32, -stdv, stdv),
        "b1": jax.random.uniform(k2, (n_hid,), jnp.float32, -stdv, stdv),
        "w2": jax.random.uniform(k3, (n_hid, n_hid), jnp.float32, -stdv, stdv),
        "b2": jax.random.uniform(k4, (n_hid,), jnp.float32, -stdv, stdv),
    }


def hgnn_embedding_forward(params, x, G, *, dropout_p=0.5, dropout_seed=0,
                           training=True, tm=512, tn=512, tk=1024,
                           use_hw_prng=None):
    M, in_ch = x.shape
    n_hid = params["w1"].shape[1]
    assert G.shape == (M, M)
    assert params["w1"].shape == (in_ch, n_hid)
    assert params["w2"].shape == (n_hid, n_hid)

    if use_hw_prng is None:
        use_hw_prng = (jax.default_backend() == "tpu")

    # NOTE: the PyTorch reference calls F.dropout(x, p) (training defaults to True),
    # i.e. dropout is applied even in eval mode; `training=False` here is an
    # explicit opt-out used for deterministic testing.
    p1 = float(dropout_p) if training else 0.0

    # ---- padded sizes & tiles (never let a block balloon to an unaligned full dim)
    M_pad = _round_up(M, 128)
    Nh_pad = _round_up(n_hid, 128)
    in_pad = _round_up(in_ch, 128)
    tm_ = _divisor_tile(M_pad, tm, 8)
    tn_ = _divisor_tile(Nh_pad, tn, 128)
    tk1 = _divisor_tile(in_pad, tk, 128)    # reduction over in_ch
    tkg = _divisor_tile(M_pad, tk, 128)     # reduction over nodes (G)
    tk2 = _divisor_tile(Nh_pad, tk, 128)    # reduction over n_hid (fallback path)

    fuse = (tn_ == Nh_pad) and (Nh_pad * Nh_pad * 2 <= _RHS_RESIDENT_BYTES)
    res1 = (tn_ == Nh_pad) and (in_pad * tn_ * 2 <= _RHS_RESIDENT_BYTES)
    resg = (tn_ == Nh_pad) and (M_pad * tn_ * 2 <= _RHS_RESIDENT_BYTES)
    res2 = (tn_ == Nh_pad) and (Nh_pad * tn_ * 2 <= _RHS_RESIDENT_BYTES)

    # ---- bf16 inputs for the MXU, zero-padded to tile multiples
    x_p = _pad2d(x, M_pad, in_pad, jnp.bfloat16)
    G_p = _pad2d(G, M_pad, M_pad, jnp.bfloat16)
    w1_p = _pad2d(params["w1"], in_pad, Nh_pad, jnp.bfloat16)
    w2_p = _pad2d(params["w2"], Nh_pad, Nh_pad, jnp.bfloat16)
    b1_p = _pad1d(params["b1"], Nh_pad)
    b2_p = _pad1d(params["b2"], Nh_pad)

    # layer 1 linear: xw1 = x @ W1 + b1   (bf16 out, f32 accumulation)
    xw1 = linear_bias(x_p, w1_p, b1_p, tm=tm_, tn=tn_, tk=tk1, rhs_resident=res1)

    if fuse:
        # xw2 = dropout(relu(G @ xw1)) @ W2 + b2, all fused into one kernel
        xw2 = g_propagate(G_p, xw1, w2=w2_p, b2=b2_p, tm=tm_, tn=tn_, tk=tkg,
                          rhs_resident=resg, dropout_p=p1,
                          dropout_seed=dropout_seed, use_hw_prng=use_hw_prng)
    else:
        h1 = g_propagate(G_p, xw1, tm=tm_, tn=tn_, tk=tkg, rhs_resident=resg,
                         dropout_p=p1, dropout_seed=dropout_seed,
                         use_hw_prng=use_hw_prng)
        xw2 = linear_bias(h1, w2_p, b2_p, tm=tm_, tn=tn_, tk=tk2, rhs_resident=res2)

    out = g_propagate(G_p, xw2, tm=tm_, tn=tn_, tk=tkg, rhs_resident=resg,
                      dropout_p=0.0, out_dtype=jnp.float32)
    return out[:M, :n_hid]


# ---------------------------------------------------------------------------
# demo / self-test
# ---------------------------------------------------------------------------
if __name__ == "__main__":
    key = jax.random.PRNGKey(0)

    def reference(params, x, G):
        # emulate the kernel's bf16-in / f32-accumulate arithmetic
        bf = lambda a: a.astype(jnp.bfloat16).astype(jnp.float32)
        xw1 = bf(bf(x) @ bf(params["w1"]) + params["b1"])
        h1 = jnp.maximum(bf(G) @ xw1, 0.0)
        xw2 = bf(bf(h1) @ bf(params["w2"]) + params["b2"])
        return jnp.maximum(bf(G) @ xw2, 0.0)

    # --- config 1: fused layer-2 path, padded shapes, multi-block grids -------
    N1, C1, H1 = 200, 96, 120
    k1, k2, k3, key = jax.random.split(key, 4)
    x1 = jax.random.normal(k1, (N1, C1), jnp.float32)
    G1 = jax.random.normal(k2, (N1, N1), jnp.float32) / math.sqrt(N1)
    p1 = init_hgnn_embedding_params(k3, C1, H1)

    out1 = hgnn_embedding_forward(p1, x1, G1, training=False,
                                  tm=128, tn=128, tk=128)
    out1 = jax.block_until_ready(out1)
    ref1 = reference(p1, x1, G1)
    assert out1.shape == (N1, H1) and out1.dtype == jnp.float32
    assert jnp.allclose(out1, ref1, atol=3e-2, rtol=3e-2), "config-1 mismatch"

    # --- config 2: non-fused fallback path (n_hid > tn, streamed RHS) ---------
    N2, C2, H2 = 192, 64, 256
    k4, k5, k6, key = jax.random.split(key, 4)
    x2 = jax.random.normal(k4, (N2, C2), jnp.float32)
    G2 = jax.random.normal(k5, (N2, N2), jnp.float32) / math.sqrt(N2)
    p2 = init_hgnn_embedding_params(k6, C2, H2)

    out2 = hgnn_embedding_forward(p2, x2, G2, training=False,
                                  tm=128, tn=128, tk=128)
    out2 = jax.block_until_ready(out2)
    ref2 = reference(p2, x2, G2)
    assert out2.shape == (N2, H2)
    assert jnp.allclose(out2, ref2, atol=3e-2, rtol=3e-2), "config-2 mismatch"

    # --- training forward: dropout p=0.5 fused into the layer-1 epilogue ------
    out_train = hgnn_embedding_forward(p1, x1, G1, dropout_p=0.5,
                                       dropout_seed=123, training=True,
                                       tm=128, tn=128, tk=128)
    out_train = jax.block_until_ready(out_train)
    assert out_train.shape == (N1, H1) and out_train.dtype == jnp.float32
    assert bool(jnp.all(jnp.isfinite(out_train)))

    print("KERNEL_OK")
</pallas_src>

<mosaic_0001>
module attributes {stable_mosaic.version = 11 : i64} {
  func.func @_linear_bias_kernel(%arg0: i32, %arg1: i32, %arg2: i32, %arg3: memref<128x128xbf16, #tpu.memory_space<vmem>>, %arg4: memref<128x128xbf16, #tpu.memory_space<vmem>>, %arg5: memref<1x128xf32, #tpu.memory_space<vmem>>, %arg6: memref<128x128xbf16, #tpu.memory_space<vmem>>, %arg7: memref<128x128xf32, #tpu.memory_space<vmem>>) attributes {dimension_semantics = [#tpu.dimension_semantics<parallel>, #tpu.dimension_semantics<parallel>, #tpu.dimension_semantics<arbitrary>], iteration_bounds = array<i64: 2, 1, 1>, scalar_prefetch = 0 : i64, scratch_operands = 1 : i64, tpu.core_type = #tpu.core_type<tc>, window_params = [{transform_indices = @transform_0, window_bounds = array<i64: 128, 128>}, {transform_indices = @transform_1, window_bounds = array<i64: 128, 128>}, {transform_indices = @transform_2, window_bounds = array<i64: 1, 128>}, {transform_indices = @transform_3, window_bounds = array<i64: 128, 128>}]} {
    %c128_i32 = arith.constant 128 : i32
    %0 = arith.muli %arg2, %c128_i32 : i32
    %1 = arith.index_cast %0 : i32 to index
    %c0 = arith.constant 0 : index
    %2 = vector.load %arg4[%1, %c0] : memref<128x128xbf16, #tpu.memory_space<vmem>>, vector<128x128xbf16>
    %c0_0 = arith.constant 0 : index
    %c0_1 = arith.constant 0 : index
    %3 = vector.load %arg3[%c0_0, %c0_1] : memref<128x128xbf16, #tpu.memory_space<vmem>>, vector<128x128xbf16>
    %cst = arith.constant dense<0.000000e+00> : vector<128x128xf32>
    %4 = tpu.matmul %3, %2, %cst {dimension_numbers = #tpu.dot_dimension_numbers<[1], [0], [0], [1], [0, 0, 1, 1], [], []>} : vector<128x128xbf16>, vector<128x128xbf16>, vector<128x128xf32> -> vector<128x128xf32>
    %c0_i32 = arith.constant 0 : i32
    %5 = arith.cmpi eq, %arg2, %c0_i32 : i32
    %6 = arith.extui %5 : i1 to i32
    %c0_i32_2 = arith.constant 0 : i32
    %7 = arith.cmpi ne, %6, %c0_i32_2 : i32
    scf.if %7 {
      %c0_7 = arith.constant 0 : index
      %c0_8 = arith.constant 0 : index
      %14 = vector.load %arg7[%c0_7, %c0_8] : memref<128x128xf32, #tpu.memory_space<vmem>>, vector<128x128xf32>
      tpu.vector_store %arg7[%c0_7, %c0_8], %4 {strides = array<i32>} : memref<128x128xf32, #tpu.memory_space<vmem>>, vector<128x128xf32>,
    } else {
    }
    %c0_i32_3 = arith.constant 0 : i32
    %8 = arith.cmpi sgt, %arg2, %c0_i32_3 : i32
    %9 = arith.extui %8 : i1 to i32
    %c0_i32_4 = arith.constant 0 : i32
    %10 = arith.cmpi ne, %9, %c0_i32_4 : i32
    scf.if %10 {
      %c0_7 = arith.constant 0 : index
      %c0_8 = arith.constant 0 : index
      %14 = vector.load %arg7[%c0_7, %c0_8] : memref<128x128xf32, #tpu.memory_space<vmem>>, vector<128x128xf32>
      %15 = arith.addf %14, %4 : vector<128x128xf32>
      %c0_9 = arith.constant 0 : index
      %c0_10 = arith.constant 0 : index
      %16 = vector.load %arg7[%c0_9, %c0_10] : memref<128x128xf32, #tpu.memory_space<vmem>>, vector<128x128xf32>
      tpu.vector_store %arg7[%c0_9, %c0_10], %15 {strides = array<i32>} : memref<128x128xf32, #tpu.memory_space<vmem>>, vector<128x128xf32>,
    } else {
    }
    %c0_i32_5 = arith.constant 0 : i32
    %11 = arith.cmpi eq, %arg2, %c0_i32_5 : i32
    %12 = arith.extui %11 : i1 to i32
    %c0_i32_6 = arith.constant 0 : i32
    %13 = arith.cmpi ne, %12, %c0_i32_6 : i32
    scf.if %13 {
      %c0_7 = arith.constant 0 : index
      %c0_8 = arith.constant 0 : index
      %14 = vector.load %arg7[%c0_7, %c0_8] : memref<128x128xf32, #tpu.memory_space<vmem>>, vector<128x128xf32>
      %c0_9 = arith.constant 0 : index
      %c0_10 = arith.constant 0 : index
      %15 = vector.load %arg5[%c0_9, %c0_10] : memref<1x128xf32, #tpu.memory_space<vmem>>, vector<1x128xf32>
      %16 = vector.broadcast %15 : vector<1x128xf32> to vector<128x128xf32>
      %17 = arith.addf %14, %16 : vector<128x128xf32>
      %18 = arith.truncf %17 : vector<128x128xf32> to vector<128x128xbf16>
      %c0_11 = arith.constant 0 : index
      %c0_12 = arith.constant 0 : index
      %19 = vector.load %arg6[%c0_11, %c0_12] : memref<128x128xbf16, #tpu.memory_space<vmem>>, vector<128x128xbf16>
      tpu.vector_store %arg6[%c0_11, %c0_12], %18 {strides = array<i32>} : memref<128x128xbf16, #tpu.memory_space<vmem>>, vector<128x128xbf16>,
    } else {
    }
    return
  }
  func.func @transform_0(%arg0: i32, %arg1: i32, %arg2: i32) -> (i32, i32) {
    %c0_i32 = arith.constant 0 : i32
    return %arg0, %arg2 : i32, i32
  }
  func.func @transform_1(%arg0: i32, %arg1: i32, %arg2: i32) -> (i32, i32) {
    %c0_i32 = arith.constant 0 : i32
    %c0_i32_0 = arith.constant 0 : i32
    return %c0_i32, %arg1 : i32, i32
  }
  func.func @transform_2(%arg0: i32, %arg1: i32, %arg2: i32) -> (i32, i32) {
    %c0_i32 = arith.constant 0 : i32
    %c0_i32_0 = arith.constant 0 : i32
    return %c0_i32, %arg1 : i32, i32
  }
  func.func @transform_3(%arg0: i32, %arg1: i32, %arg2: i32) -> (i32, i32) {
    %c0_i32 = arith.constant 0 : i32
    return %arg0, %arg1 : i32, i32
  }
}

</mosaic_0001>

<bundles_post_ra>
// kernel: tpu_custom_call.1
= control target key start
LH: loop header
LB: loop body
LE: loop exit
PB: predicated region body
PF: predicated region fallthrough
CT: control target
= control target key end

     0   :  { %8 = vsyncpa [#allocation4], 0  ;;  %s1460_s0 = inlined_call_operand.hbm [shape: bf16[256,128], index: 0, kind: input, shape index: {}]   ;;  %s1461_s1 = inlined_call_operand.hbm [shape: bf16[128,128], index: 1, kind: input, shape index: {}]   ;;  %s1462_s2 = inlined_call_operand.vmem [shape: f32[1,128], index: 2, kind: input, shape index: {}]   ;;  %s1463_s3 = inlined_call_operand.hbm [shape: bf16[256,128], index: 3, kind: output, shape index: {}]  }
   0x1   :  { %10 = vsyncpa [#allocation4 + $0x1], 0 }
   0x2   :  { %11 = vsyncpa [#allocation7], 0 }
   0x3   :  { %12 = vsyncpa [#allocation5], 0 }
   0x4   :  { %14 = vsyncpa [#allocation5 + $0x1], 0  ;;  %s1245_s12 = smov 0   ;;  %s1247_s13 = smov 0  }
   0x5   :  { %s1249_s14 = smov 0   ;;  %s1251_s15 = smov 0  }
   0x6   :  { %s1253_s16 = smov 0   ;;  %s1255_s17 = smov 0  }
   0x7 LB: > { %s805_s18 = sadd.s32 4294967295, %s1216_s17   ;;  %s806_s19 = sadd.s32 4294967294, %s1216_s17   ;;  %s1216_s17 = sphi %s1255_s17, %s20_s17   ;;  %s1212_s16 = sphi %s1253_s16, %s1485_s16   ;;  %s1208_s15 = sphi %s1251_s15, %s1484_s15   ;;  %s1204_s14 = sphi %s1249_s14, %s1483_s14   ;;  %s1200_s13 = sphi %s1247_s13, %s1482_s13   ;;  %s1196_s12 = sphi %s1245_s12, %s1481_s12  }
   0x8   : > { %p61_p0 = scmp.ne.s32.totalorder %s1200_s13, %s1196_s12  ;;  %p1279_p1 = scmp.eq.s32.totalorder %s805_s18, 0 }
   0x9   : > { %p1283_p2 = scmp.eq.s32.totalorder %s805_s18, 1  ;;  %p145_p3 = scmp.eq.s32.totalorder %s806_s19, 1 }
   0xa   : > { %p1289_p4 = por %p1279_p1, %p61_p0  ;;  %p807_p5 = scmp.ge.s32.totalorder %s1216_s17, 1 }
   0xb   : > { %p1294_p6 = por %p145_p3, %p61_p0  ;;  %p152_p7 = scmp.lt.s32.totalorder %s1216_s17, 3 }
   0xc   : > { %s1469_s22 = scalar_select %p1289_p4, 1, 0 }
   0xd   : > { %s1470_s23 = scalar_select %p1294_p6, 1, 0 }
   0xe   : > { %p1299_p8 = pnand %p807_p5, %p152_p7  ;;  %s1218_s25 = smov [#allocation6]  }
   0xf   : > { %s166_s26 = sshll.u32 %s1218_s25, 4  ;;  %s39_s28 = sadd.s32 1, %s1212_s16  ;;  %s167_s26 = int_to_ptr.vmem [resolvable:$true] %s166_s26 }
  0x10   : > { %p993_p9 = pneg %p1299_p8  ;;  %s1089_s29 = scalar_lea.vmem %s167_s26, 1024 }
  0x11   : > { %p1090_p13 = scmp.ne.s32.totalorder %s167_s26, %s1089_s29  ;;  %p1097_p5 = scmp.lt.s32.totalorder %s167_s26, %s167_s26 }
  0x12   : > { %p1308_p11 = pnand %p993_p9, %p1279_p1  ;;  %p1098_p7 = scmp.lt.s32.totalorder %s1089_s29, %s1089_s29 }
  0x14   : > { %p1080_p12 = pneg %p1308_p11  ;;  %p1099_p6 = por %p1098_p7, %p1097_p5 }
  0x16   : > { %p1092_p0 = pnand %p1090_p13, %p1080_p12 }
  0x18   : > { %p1093_p3 = pneg %p1092_p0 }
  0x1a   : > { %p1100_p4 = pnand %p1099_p6, %p1093_p3 }
  0x1c   : > { %1103 = shalt.err (!%p1100_p4)
}
  0x1d   : > { %s1465_s30 = smov 64   ;;  %s1466_s4 = smov 4  }
  0x1e   : > { %996 = dma.hbm_to_vmem [thread:$0]  (!%p1308_p11), %s1461_s1, 1024, %s167_s26, [#allocation7], %s1465_s30, %s1465_s30, %s1466_s4  }
  0x1f   : > { %p41_p4 = scmp.ge.s32.totalorder %s39_s28, 2  ;;  %s48_s7 = sadd.s32 1, %s1204_s14 }
  0x20   : > { %p55_p6 = scmp.ne.s32.totalorder %s1204_s14, %s1200_s13  ;;  %p56_p9 = scmp.eq.s32.totalorder %s1216_s17, 0 }
  0x21   : > { %s1487_s28 = smov (%p41_p4, %s39_s28), 0  ;;  %p1006_p0 = scmp.lt.s32.totalorder %s1216_s17, 2 }
  0x22   : > { %p1329_p12 = por %p56_p9, %p55_p6  ;;  %p1335_p13 = por %p1283_p2, %p55_p6 }
  0x23   : > { %s43_s10 = ssub.s32 %s1212_s16, %s1487_s28  ;;  %s186_s11 = sand.u32 1, %s1204_s14  }
  0x24   : > { %p46_p11 = scmp.eq.s32.totalorder %s43_s10, 0  ;;  %s811_s18 = sshll.u32 %s186_s11, 6 }
  0x25   : > { %s856_s25 = sshll.u32 %s1212_s16, 10  ;;  %s190_s5 = scalar_lea.vmem [#allocation3], %s811_s18 }
  0x26   : > { %s1344_s19 = scalar_select %p46_p11, %s1204_s14, %s48_s7  }
  0x27   : > { %s197_s29 = scalar_lea.hbm %s1460_s0, %s856_s25  ;;  %s198_s6 = sshll.u32 %s190_s5, 4  ;;  %s199_s6 = int_to_ptr.vmem [resolvable:$true] %s198_s6 }
  0x28   : > { %p1352_p2 = pnand %p1006_p0, %p1329_p12  ;;  %s187_s30 = scalar_lea.sflag [#allocation4], %s186_s11 }
  0x29   : > { %s1117_s10 = scalar_lea.vmem %s199_s6, 1024  ;;  %s1221_s7 = smov [#allocation3]  }
  0x2a   : > { %p1106_p3 = pneg %p1352_p2  ;;  %p1118_p5 = scmp.ne.s32.totalorder %s199_s6, %s1117_s10 }
  0x2b   : > { %s1122_s4 = sshll.u32 %s1221_s7, 4  ;;  %s1123_s4 = int_to_ptr.vmem [resolvable:$false] %s1122_s4 }
  0x2c   : > { %p1120_p7 = pnand %p1118_p5, %p1106_p3  ;;  %s1124_s25 = scalar_lea.vmem %s1123_s4, 2048 }
  0x2d   : > { %p1125_p6 = scmp.lt.s32.totalorder %s199_s6, %s1123_s4  ;;  %p1126_p9 = scmp.lt.s32.totalorder %s1124_s25, %s1117_s10 }
  0x2e   : > { %p1121_p4 = pneg %p1120_p7 }
  0x2f   : > { %p1127_p11 = por %p1126_p9, %p1125_p6 }
  0x31   : > { %p1128_p10 = pnand %p1127_p11, %p1121_p4 }
  0x33   : > { %1131 = shalt.err (!%p1128_p10)
}
  0x34   : > { %s1476_s8 = smov 4   ;;  %s1477_s18 = smov 64  }
  0x35   : > { %1000 = dma.hbm_to_vmem [thread:$0]  (!%p1352_p2), %s197_s29, 1024, %s199_s6, %s187_s30, %s1477_s18, %s1477_s18, %s1476_s8  }
  0x36   : > { %210 = sbr.rel (%p1299_p8) target bundleno = 320 (0x140), region = 32  ;;  %s1366_s11 = sand.u32 (!%p1299_p8), 1, %s1200_s13  }
  0x37   : > { %s815_s4 = sshll.u32 (!%p1299_p8), %s1366_s11, 6  ;;  %s213_s26 = scalar_lea.sflag (!%p1299_p8), [#allocation4], %s1366_s11 }
  0x38   : > { %s1372_s27 = scalar_lea.vmem (!%p1299_p8), [#allocation3], %s815_s4  ;;  %p1478_p10 = scmp.ne.s32.totalorder (!%p1299_p8), %s1469_s22, 0 }
  0x3b   : > { %1183 = dma.done.wait (%p1478_p10), %s213_s26, 1024  }
  0x3c   : > { %1185 = vsyncadd (%p1478_p10), %s213_s26, 4294966272 }
  0x3d   : > { %1187 = dma.done.wait (%p1279_p1), [#allocation7], 1024  }
  0x3e   : > { %1189 = vsyncadd (%p1279_p1), [#allocation7], 4294966272  ;;  %v1062_v0 = vld [vmem:[#allocation6 + $0x38] sm:$0xff]   ;;  %v1063_v1 = vld [vmem:[#allocation6 + $0x30] sm:$0xff]   ;;  %s1395_s24 = scalar_lea.vmem [#allocation8], %s815_s4  ;;  %s873_s29 = sshll.u32 %s1208_s15, 10 }
  0x3f   : > { %937 = vmatprep.subr.bf16.mxu0 %v1062_v0  ;;  %969 = vmatprep.subr.bf16.mxu1 %v1062_v0  ;;  %v1064_v2 = vld [vmem:[#allocation6 + $0x28] sm:$0xff]   ;;  %v1065_v3 = vld [vmem:[#allocation6 + $0x20] sm:$0xff]   ;;  %v1066_v6 = vld [vmem:[#allocation6 + $0x18] sm:$0xff]   ;;  %s691_s30 = sshll.u32 %s1395_s24, 4  ;;  %s1408_s21 = scalar_lea.hbm %s1463_s3, %s873_s29  ;;  %s1403_s30 = int_to_ptr.vmem [resolvable:$true] %s691_s30 }
  0x40   : > { %938 = vmatpush3.bf16.msra.mxu0 %v1062_v0  ;;  %977 = vmatpush3.bf16.msra.mxu1 %v1062_v0  ;;  %v1070_v4 = vld [vmem:[%s1372_s27] sm:$0xff]   ;;  %v1067_v7 = vld [vmem:[#allocation6 + $0x10] sm:$0xff]   ;;  %v1068_v8 = vld [vmem:[#allocation6 + $0x8] sm:$0xff]   ;;  %s677_s15 = scalar_lea.sflag [#allocation5], %s1366_s11  ;;  %s1132_s10 = scalar_lea.vmem %s1403_s30, 1024 }
  0x41   : > { %939 = vmatprep.subr.bf16.mxu0 %v1063_v1  ;;  %970 = vmatprep.subr.bf16.mxu1 %v1063_v1  ;;  %v1071_v5 = vld [vmem:[%s1372_s27 + $0x20] sm:$0xff]   ;;  %v1072_v10 = vld [vmem:[%s1372_s27 + $0x8] sm:$0xff]   ;;  %v1074_v12 = vld [vmem:[%s1372_s27 + $0x10] sm:$0xff]   ;;  %p1133_p1 = scmp.ne.s32.totalorder %s1403_s30, %s1132_s10  ;;  %s1222_s7 = smov [#allocation8]  }
  0x42   : > { %953 = vmatprep.mubr.bf16.mxu0 %v1070_v4  ;;  %961 = vmatprep.mubr.bf16.mxu1 %v1071_v5  ;;  %v1069_v9 = vld [vmem:[#allocation6] sm:$0xff]   ;;  %v1073_v11 = vld [vmem:[%s1372_s27 + $0x28] sm:$0xff]   ;;  %v1075_v13 = vld [vmem:[%s1372_s27 + $0x30] sm:$0xff]   ;;  %s1136_s25 = sshll.u32 %s1222_s7, 4  ;;  %s1137_s25 = int_to_ptr.vmem [resolvable:$false] %s1136_s25 }
  0x43   : > { %v1076_v14 = vld [vmem:[%s1372_s27 + $0x18] sm:$0xff]   ;;  %v834_v18 = vld [vmem:[%s1462_s2] ss:$0 sm:$0xff]  ;;  %p1134_p8 = pnand %p1133_p1, %p1335_p13  ;;  %s1138_s8 = scalar_lea.vmem %s1137_s25, 2048 }
  0x44   : > { %940 = vmatpush3.bf16.msra.mxu0 %v1063_v1  ;;  %978 = vmatpush3.bf16.msra.mxu1 %v1063_v1  ;;  %v1077_v15 = vld [vmem:[%s1372_s27 + $0x38] sm:$0xff]   ;;  %p1139_p0 = scmp.lt.s32.totalorder %s1403_s30, %s1137_s25  ;;  %p1140_p2 = scmp.lt.s32.totalorder %s1138_s8, %s1132_s10 }
  0x45   : > { %941 = vmatprep.subr.bf16.mxu0 %v1064_v2  ;;  %971 = vmatprep.subr.bf16.mxu1 %v1064_v2  ;;  %p1135_p12 = pneg %p1134_p8 }
  0x46   : > { %p1141_p3 = por %p1140_p2, %p1139_p0 }
  0x48   : > { %942 = vmatpush3.bf16.msra.mxu0 %v1064_v2  ;;  %979 = vmatpush3.bf16.msra.mxu1 %v1064_v2  ;;  %p1142_p5 = pnand %p1141_p3, %p1135_p12 }
  0x49   : > { %943 = vmatprep.subr.bf16.mxu0 %v1065_v3  ;;  %972 = vmatprep.subr.bf16.mxu1 %v1065_v3 }
  0x4c   : > { %944 = vmatpush3.bf16.msra.mxu0 %v1065_v3  ;;  %980 = vmatpush3.bf16.msra.mxu1 %v1065_v3 }
  0x4d   : > { %945 = vmatprep.subr.bf16.mxu0 %v1066_v6  ;;  %973 = vmatprep.subr.bf16.mxu1 %v1066_v6 }
  0x50   : > { %946 = vmatpush3.bf16.msra.mxu0 %v1066_v6  ;;  %981 = vmatpush3.bf16.msra.mxu1 %v1066_v6 }
  0x51   : > { %947 = vmatprep.subr.bf16.mxu0 %v1067_v7  ;;  %974 = vmatprep.subr.bf16.mxu1 %v1067_v7 }
  0x54   : > { %948 = vmatpush3.bf16.msra.mxu0 %v1067_v7  ;;  %982 = vmatpush3.bf16.msra.mxu1 %v1067_v7 }
  0x55   : > { %949 = vmatprep.subr.bf16.mxu0 %v1068_v8  ;;  %975 = vmatprep.subr.bf16.mxu1 %v1068_v8 }
  0x58   : > { %950 = vmatpush3.bf16.msra.mxu0 %v1068_v8  ;;  %983 = vmatpush3.bf16.msra.mxu1 %v1068_v8 }
  0x59   : > { %951 = vmatprep.subr.bf16.mxu0 %v1069_v9  ;;  %976 = vmatprep.subr.bf16.mxu1 %v1069_v9 }
  0x5c   : > { %952 = vmatpush3.bf16.msra.mxu0 %v1069_v9  ;;  %984 = vmatpush3.bf16.msra.mxu1 %v1069_v9 }
  0x5f   : > { %954 = vmatmul.mubr.bf16.vlgmr.msra.gmra.mxu0 %v1072_v10  ;;  %962 = vmatmul.mubr.bf16.vlgmr.msra.gmra.mxu1 %v1073_v11 }
  0x60   : > { %957 = vmatprep.mubr.bf16.mxu0 %v1074_v12  ;;  %965 = vmatprep.mubr.bf16.mxu1 %v1075_v13 }
  0x67   : > { %958 = vmatmul.mubr.bf16.gmra.mxu0 %v1076_v14  ;;  %966 = vmatmul.mubr.bf16.gmra.mxu1 %v1077_v15 }
 0x11f   : > { %v955_v16 = vpop.f32.mrf.mxu0  ;;  %v963_v17 = vpop.f32.mrf.mxu1 }
 0x120   : > { %v582_v23 = vadd.f32 %v955_v16, %v834_v18  ;;  %v590_v24 = vadd.f32 %v963_v17, %v834_v18 }
 0x121   : > { %v419_v19 = vpop.f32.mrf.mxu0  ;;  %v451_v20 = vpop.f32.mrf.mxu1 }
 0x122   : > { %v580_v27 = vadd.f32 %v834_v18, %v419_v19  ;;  %v588_v28 = vadd.f32 %v834_v18, %v451_v20 }
 0x123   : > { %v956_v21 = vpop.f32.mrf.mxu0  ;;  %v964_v22 = vpop.f32.mrf.mxu1 }
 0x124   : > { %v583_v25 = vadd.f32 %v956_v21, %v834_v18  ;;  %v591_v26 = vadd.f32 %v964_v22, %v834_v18 }
 0x125   : > { %v422_v29 = vpop.f32.mrf.mxu0  ;;  %v454_v30 = vpop.f32.mrf.mxu1 }
 0x126   : > { %v882_v31 = vpack.c.bf16 %v583_v25, %v582_v23  ;;  %v902_v32 = vpack.c.bf16 %v591_v26, %v590_v24  ;;  %v581_v33 = vadd.f32 %v834_v18, %v422_v29  ;;  %v589_v34 = vadd.f32 %v834_v18, %v454_v30 }
 0x127   : > { %v959_v35 = vpop.f32.mrf.mxu0  ;;  %v967_v36 = vpop.f32.mrf.mxu1 }
 0x128   : > { %914 = vst [vmem:[%s1395_s24 + $0x8] sm:$0xff] %v882_v31   ;;  %918 = vst [vmem:[%s1395_s24 + $0x28] sm:$0xff] %v902_v32   ;;  %v877_v37 = vpack.c.bf16 %v581_v33, %v580_v27  ;;  %v897_v38 = vpack.c.bf16 %v589_v34, %v588_v28  ;;  %v586_v43 = vadd.f32 %v959_v35, %v834_v18 }
 0x129   : > { %v435_v39 = vpop.f32.mrf.mxu0  ;;  %v467_v40 = vpop.f32.mrf.mxu1  ;;  %v594_v44 = vadd.f32 %v967_v36, %v834_v18 }
 0x12a   : > { %878 = vst [vmem:[%s1395_s24] sm:$0xff] %v877_v37   ;;  %917 = vst [vmem:[%s1395_s24 + $0x20] sm:$0xff] %v897_v38   ;;  %v584_v47 = vadd.f32 %v834_v18, %v435_v39  ;;  %v592_v48 = vadd.f32 %v834_v18, %v467_v40 }
 0x12b   : > { %v960_v41 = vpop.f32.mrf.mxu0  ;;  %v968_v42 = vpop.f32.mrf.mxu1 }
 0x12c   : > { %v587_v45 = vadd.f32 %v960_v41, %v834_v18  ;;  %v595_v46 = vadd.f32 %v968_v42, %v834_v18 }
 0x12d   : > { %v438_v49 = vpop.f32.mrf.mxu0  ;;  %v470_v50 = vpop.f32.mrf.mxu1 }
 0x12e   : > { %v892_v51 = vpack.c.bf16 %v587_v45, %v586_v43  ;;  %v912_v52 = vpack.c.bf16 %v595_v46, %v594_v44  ;;  %v585_v53 = vadd.f32 %v834_v18, %v438_v49  ;;  %v593_v54 = vadd.f32 %v834_v18, %v470_v50 }
 0x130   : > { %916 = vst [vmem:[%s1395_s24 + $0x18] sm:$0xff] %v892_v51   ;;  %920 = vst [vmem:[%s1395_s24 + $0x38] sm:$0xff] %v912_v52   ;;  %v887_v55 = vpack.c.bf16 %v585_v53, %v584_v47  ;;  %v907_v56 = vpack.c.bf16 %v593_v54, %v592_v48 }
 0x132   : > { %915 = vst [vmem:[%s1395_s24 + $0x10] sm:$0xff] %v887_v55   ;;  %919 = vst [vmem:[%s1395_s24 + $0x30] sm:$0xff] %v907_v56  }
 0x133   : > { %1145 = shalt.err (!%p1142_p5)
}
 0x134   : > { %s1146_s18 = scalar_lea.hbm %s1408_s21, 1024  ;;  %s1150_s27 = scalar_lea.hbm %s1463_s3, 2048 }
 0x135   : > { %p1147_p7 = scmp.ne.s32.totalorder %s1408_s21, %s1146_s18  ;;  %p1151_p9 = scmp.lt.s32.totalorder %s1408_s21, %s1463_s3 }
 0x136   : > { %p1152_p11 = scmp.lt.s32.totalorder %s1150_s27, %s1146_s18 }
 0x137   : > { %p1148_p4 = pnand %p1147_p7, %p1335_p13 }
 0x138   : > { %p1153_p10 = por %p1152_p11, %p1151_p9 }
 0x139   : > { %p1149_p6 = pneg %p1148_p4 }
 0x13b   : > { %p1154_p1 = pnand %p1153_p10, %p1149_p6 }
 0x13d   : > { %1157 = shalt.err (!%p1154_p1)
}
 0x13e   : > { %s1223_s24 = smov 64   ;;  %s1224_s29 = smov 4  }
 0x13f   : > { %991 = dma.vmem_to_hbm [thread:$0]  (%p1335_p13), %s1403_s30, 1024, %s1408_s21, %s677_s15, %s1223_s24, %s1223_s24, %s1224_s29  }
 0x140 PF: > { %s706_s5 = sand.u32 1, %s1196_s12   ;;  %p1479_p8 = scmp.ne.s32.totalorder %s1470_s23, 0 }
 0x141   : > { %p1480_p12 = scmp.ge.s32.totalorder %s1216_s17, 2  ;;  %s707_s6 = scalar_lea.sflag [#allocation5], %s706_s5 }
 0x143   : > { %p1002_p0 = pnand %p1480_p12, %p1479_p8 }
 0x145   : > { %p1003_p2 = pneg %p1002_p0 }
 0x147   : > { %1191 = dma.done.wait (%p1003_p2), %s707_s6, 1024  }
 0x148   : > { %1193 = vsyncadd (%p1003_p2), %s707_s6, 4294966272  ;;  %s20_s17 = sadd.s32 1, %s1216_s17   ;;  %s1481_s12 = smov %s1200_s13 }
 0x149   : > { %p17_p3 = scmp.ge.s32.totalorder %s20_s17, 4   ;;  %s1482_s13 = smov %s1204_s14 }
 0x14a   : > { %s1483_s14 = smov %s1344_s19  ;;  %s1484_s15 = smov %s1212_s16 }
 0x14b   : > { %s1485_s16 = smov %s1487_s28  ;;  %19 = sbr.rel (!%p17_p3) target bundleno = 7 (0x7), region = 98 }
 0x150   :  { %712 = vsyncpa [#allocation4], 1 }
 0x151   :  { %714 = vsyncpa [#allocation4 + $0x1], 1 }
 0x152   :  { %715 = vsyncpa [#allocation7], 1 }
 0x153   :  { %716 = vsyncpa [#allocation5], 1 }
 0x154   :  { %718 = vsyncpa [#allocation5 + $0x1], 1 }

</bundles_post_ra>
